<compile_context>
chip_gen: v5e
topology: v5e:2x2
jax: 0.10.0
libtpu: 0.0.40
codegen_flags: <defaults>
</compile_context>

<pallas_src>
import math

import jax
import jax.numpy as jnp
from jax.experimental import pallas as pl
from jax.experimental.pallas import tpu as pltpu

_INV_SQRT2 = 1.0 / math.sqrt(2.0)
_MIB = 2 ** 20


def _round_up(x: int, m: int) -> int:
    return ((x + m - 1) // m) * m


def _vmem_capacity_bytes() -> int:
    """Physical VMEM of the local TPU (conservative 64 MiB fallback = v7x)."""
    try:
        cap = getattr(pltpu.get_tpu_info(), "vmem_capacity_bytes", None)
        if cap:
            return int(cap)
    except Exception:
        pass
    return 64 * _MIB


# ----------------------------------------------------------------------------
# DownSampleBlock: (B, S, C) -> (B, S/4, 4C)   (exact replica of the torch ops)
# ----------------------------------------------------------------------------
# TODO(synk): fuse this 2x2 stride-2 spatial gather into the kernel input DMA
# (four phase BlockSpecs or a manual strided copy) to remove one full HBM
# write+read of the activations; kept in plain JAX because BlockSpec index_maps
# cannot express the stride-2 gather + lane-concat directly.
def downsample_block(x: jax.Array) -> jax.Array:
    b, seq, c = x.shape
    h = w = int(seq ** 0.5)
    v = x.reshape(b, h, w, c)
    if h % 2 == 1:
        v = jnp.concatenate([v, jnp.zeros((b, 1, w, c), v.dtype)], axis=1)
        h += 1
    if w % 2 == 1:
        v = jnp.concatenate([v, jnp.zeros((b, h, 1, c), v.dtype)], axis=2)
        w += 1
    v = v.reshape(b, h, w // 2, c * 2)
    v = jnp.transpose(v, (0, 2, 1, 3))
    v = v.reshape(b, h // 2, w // 2, c * 4)
    v = jnp.transpose(v, (0, 2, 1, 3))
    return v.reshape(b, -1, c * 4)


# ----------------------------------------------------------------------------
# Kernel bodies
# ----------------------------------------------------------------------------
def _layernorm_rows(x_ref, g_ref, bta_ref, out_dtype, eps=1e-5):
    """Two-pass LayerNorm over the last dim, f32 math, cast to `out_dtype`."""
    x = x_ref[...].astype(jnp.float32)
    mean = jnp.mean(x, axis=-1, keepdims=True)
    xc = x - mean
    var = jnp.mean(xc * xc, axis=-1, keepdims=True)
    xn = xc * jax.lax.rsqrt(var + eps)
    xn = xn * g_ref[...].astype(jnp.float32) + bta_ref[...].astype(jnp.float32)
    return xn.astype(out_dtype)


def _gelu_erf(h):
    # Exact-erf GELU for torch parity (VPU polynomial; hides under MXU here).
    return 0.5 * h * (1.0 + jax.lax.erf(h * _INV_SQRT2))


def _resident_kernel(x_ref, g_ref, bta_ref, w1_ref, b1_ref, w2_ref, b2_ref, o_ref):
    """Weights fully VMEM-resident; full-width LN + MLP per row tile."""
    xn = _layernorm_rows(x_ref, g_ref, bta_ref, w1_ref.dtype)
    h = jnp.dot(xn, w1_ref[...], preferred_element_type=jnp.float32)
    h = _gelu_erf(h + b1_ref[...].astype(jnp.float32))
    out = jnp.dot(h.astype(w2_ref.dtype), w2_ref[...],
                  preferred_element_type=jnp.float32)
    o_ref[...] = (out + b2_ref[...].astype(jnp.float32)).astype(o_ref.dtype)


def _tiled_kernel_f32_out(x_ref, g_ref, bta_ref, w1_ref, b1_ref, w2_ref, b2_ref,
                          o_ref, xn_ref):
    """Hidden-tiled; f32 output block IS the accumulator (resident across j)."""
    j = pl.program_id(1)

    @pl.when(j == 0)
    def _init():
        xn_ref[...] = _layernorm_rows(x_ref, g_ref, bta_ref, xn_ref.dtype)
        o_ref[...] = jnp.broadcast_to(b2_ref[...].astype(jnp.float32), o_ref.shape)

    h = jnp.dot(xn_ref[...], w1_ref[...], preferred_element_type=jnp.float32)
    h = _gelu_erf(h + b1_ref[...].astype(jnp.float32))
    o_ref[...] += jnp.dot(h.astype(w2_ref.dtype), w2_ref[...],
                          preferred_element_type=jnp.float32)


def _tiled_kernel_acc(x_ref, g_ref, bta_ref, w1_ref, b1_ref, w2_ref, b2_ref,
                      o_ref, xn_ref, acc_ref):
    """Hidden-tiled; non-f32 output -> dedicated f32 accumulator scratch."""
    j = pl.program_id(1)

    @pl.when(j == 0)
    def _init():
        xn_ref[...] = _layernorm_rows(x_ref, g_ref, bta_ref, xn_ref.dtype)
        acc_ref[...] = jnp.broadcast_to(b2_ref[...].astype(jnp.float32),
                                        acc_ref.shape)

    h = jnp.dot(xn_ref[...], w1_ref[...], preferred_element_type=jnp.float32)
    h = _gelu_erf(h + b1_ref[...].astype(jnp.float32))
    acc_ref[...] += jnp.dot(h.astype(w2_ref.dtype), w2_ref[...],
                            preferred_element_type=jnp.float32)

    @pl.when(j == pl.num_programs(1) - 1)
    def _finalize():
        o_ref[...] = acc_ref[...].astype(o_ref.dtype)


# ----------------------------------------------------------------------------
# VMEM working-set estimates (used both for planning and vmem_limit_bytes)
# ----------------------------------------------------------------------------
def _est_resident_bytes(tile_m, d_in, d_h, d_out, cbytes):
    # Weights counted with 2 pipeline buffers to stay conservative (the constant
    # index map means they are DMA'd only once, but the pipeline may still
    # allocate double buffers).
    # TODO(synk): single-buffer resident weights (pl.Buffered(1)) once verified;
    # that would roughly double the weight size eligible for residency.
    act = 2 * tile_m * d_in * 4 + 2 * tile_m * d_out * 4          # x / out tiles
    wgt = 2 * (d_in * d_h + d_h * d_out) * cbytes                 # W1 + W2
    small = 2 * (2 * d_in + d_h + d_out) * 4                      # gamma/beta/b1/b2
    tmp = tile_m * d_in * (4 + cbytes) + tile_m * d_h * 4         # LN/GELU temps
    return act + wgt + small + tmp


def _est_tiled_bytes(tile_m, d_in, tn, d_out, cbytes):
    act = 2 * tile_m * d_in * 4 + 2 * tile_m * d_out * 4
    wgt = 2 * (d_in * tn + tn * d_out) * cbytes                   # W1/W2 tiles
    small = 2 * (2 * d_in + tn + d_out) * 4
    scr = tile_m * d_in * cbytes + tile_m * d_out * 4             # xn cache + acc
    tmp = tile_m * d_in * 4 + tile_m * tn * 4
    return act + wgt + small + scr + tmp


# ----------------------------------------------------------------------------
# One-time parameter prep + tiling plan (run OUTSIDE jit / once at init)
# ----------------------------------------------------------------------------
def prepare_projector(params, *, compute_dtype=jnp.bfloat16, tile_m=256,
                      tn_max=1024, force_mode=None):
    """Casts matmul weights to the MXU compute dtype, decides weight-resident vs
    hidden-tiled execution from the chip's physical VMEM, and (for the tiled
    path) zero-pads the hidden dim and re-lays W1 out as (n_hidden, d_in, tn)
    contiguous blocks so each weight tile is a full-rate DMA."""
    w1 = jnp.asarray(params["w1"], compute_dtype)
    w2 = jnp.asarray(params["w2"], compute_dtype)
    g = jnp.asarray(params["ln_gamma"], jnp.float32).reshape(1, -1)
    bt = jnp.asarray(params["ln_beta"], jnp.float32).reshape(1, -1)
    b1 = jnp.asarray(params["b1"], jnp.float32).reshape(1, -1)
    b2 = jnp.asarray(params["b2"], jnp.float32).reshape(1, -1)

    d_in, d_h = w1.shape
    d_h2, d_out = w2.shape
    assert d_h2 == d_h, (w1.shape, w2.shape)
    cbytes = jnp.dtype(compute_dtype).itemsize

    cap = _vmem_capacity_bytes()
    budget = cap - 4 * _MIB                       # headroom for Mosaic internals

    mode = ("resident"
            if _est_resident_bytes(tile_m, d_in, d_h, d_out, cbytes) <= budget
            else "tiled")
    if force_mode is not None:
        mode = force_mode

    prep = dict(mode=mode, d_in=d_in, d_h=d_h, d_out=d_out,
                compute_dtype=compute_dtype, cbytes=cbytes, vmem_budget=budget,
                ln_gamma=g, ln_beta=bt, b2=b2)

    if mode == "resident":
        prep.update(w1=w1, b1=b1, w2=w2, tile_m=tile_m)
        return prep

    # --- tiled mode ---
    # Bigger row tiles on 128 MiB chips halve per-row-tile weight re-streaming.
    if budget >= 96 * _MIB:
        tile_m = max(tile_m, 512)

    # Hidden tile: largest 256-multiple (128 as last resort) fitting the budget.
    cands = [t for t in (1024, 768, 512, 256, 128)
             if t <= min(tn_max, _round_up(d_h, 128))]
    if not cands:
        cands = [_round_up(d_h, 128)]
    tn = cands[-1]
    for t in cands:
        if _est_tiled_bytes(tile_m, d_in, t, d_out, cbytes) <= budget:
            tn = t
            break

    d_h_pad = _round_up(d_h, tn)
    if d_h_pad != d_h:                       # pad instead of full-width fallback
        w1 = jnp.pad(w1, ((0, 0), (0, d_h_pad - d_h)))
        b1 = jnp.pad(b1, ((0, 0), (0, d_h_pad - d_h)))
        w2 = jnp.pad(w2, ((0, d_h_pad - d_h), (0, 0)))
    n_hidden = d_h_pad // tn
    # (n_hidden, d_in, tn): each hidden tile of W1 is contiguous in HBM.
    w1_blocked = w1.reshape(d_in, n_hidden, tn).transpose(1, 0, 2)

    prep.update(w1=w1_blocked, b1=b1, w2=w2, tn=tn, d_h_pad=d_h_pad,
                tile_m=tile_m)
    return prep


# ----------------------------------------------------------------------------
# Fused LayerNorm + Linear + GELU + Linear
# ----------------------------------------------------------------------------
def fused_ln_mlp(x2d: jax.Array, prep: dict) -> jax.Array:
    """x2d: (N, 4C) rows -> (N, D) rows, LN+Linear+GELU+Linear in one kernel."""
    n, d_in = x2d.shape
    assert d_in == prep["d_in"], (d_in, prep["d_in"])
    d_out = prep["d_out"]
    cdtype = prep["compute_dtype"]
    out_dtype = x2d.dtype
    budget = prep["vmem_budget"]

    # Row tiling: clamp for small inputs; keep >= 2 row tiles when there are
    # enough rows so the "parallel" axis shards across v7x's two TensorCores.
    n8 = _round_up(max(n, 1), 8)
    tile_m = min(prep["tile_m"], n8)
    if n8 >= 16:
        tile_m = min(tile_m, _round_up((n8 + 1) // 2, 8))
    n_pad = _round_up(n, tile_m)
    if n_pad != n:
        x2d = jnp.pad(x2d, ((0, n_pad - n), (0, 0)))
    n_rows = n_pad // tile_m

    if prep["mode"] == "resident":
        d_h = prep["d_h"]
        est = _est_resident_bytes(tile_m, d_in, d_h, d_out, prep["cbytes"])
        vmem_limit = int(min(budget, max(32 * _MIB, 1.2 * est)))
        out = pl.pallas_call(
            _resident_kernel,
            out_shape=jax.ShapeDtypeStruct((n_pad, d_out), out_dtype),
            grid_spec=pltpu.PrefetchScalarGridSpec(
                num_scalar_prefetch=0,
                grid=(n_rows,),
                in_specs=[
                    pl.BlockSpec((tile_m, d_in), lambda i: (i, 0)),   # x rows
                    pl.BlockSpec((1, d_in), lambda i: (0, 0)),        # ln gamma
                    pl.BlockSpec((1, d_in), lambda i: (0, 0)),        # ln beta
                    pl.BlockSpec((d_in, d_h), lambda i: (0, 0)),      # W1 resident
                    pl.BlockSpec((1, d_h), lambda i: (0, 0)),         # b1
                    pl.BlockSpec((d_h, d_out), lambda i: (0, 0)),     # W2 resident
                    pl.BlockSpec((1, d_out), lambda i: (0, 0)),       # b2
                ],
                out_specs=pl.BlockSpec((tile_m, d_out), lambda i: (i, 0)),
            ),
            compiler_params=pltpu.CompilerParams(
                dimension_semantics=("parallel",),
                vmem_limit_bytes=vmem_limit,
            ),
        )(x2d, prep["ln_gamma"], prep["ln_beta"],
          prep["w1"], prep["b1"], prep["w2"], prep["b2"])
        return out[:n]

    # --- tiled mode ---
    tn = prep["tn"]
    n_hidden = prep["w1"].shape[0]
    est = _est_tiled_bytes(tile_m, d_in, tn, d_out, prep["cbytes"])
    vmem_limit = int(min(budget, max(32 * _MIB, 1.2 * est)))

    scratch = [pltpu.VMEM((tile_m, d_in), cdtype)]        # cached LN output
    if out_dtype == jnp.float32:
        kernel = _tiled_kernel_f32_out                    # accumulate in o_ref
    else:
        kernel = _tiled_kernel_acc
        scratch.append(pltpu.VMEM((tile_m, d_out), jnp.float32))

    out = pl.pallas_call(
        kernel,
        out_shape=jax.ShapeDtypeStruct((n_pad, d_out), out_dtype),
        grid_spec=pltpu.PrefetchScalarGridSpec(
            num_scalar_prefetch=0,
            grid=(n_rows, n_hidden),
            in_specs=[
                pl.BlockSpec((tile_m, d_in), lambda i, j: (i, 0)),        # x rows
                pl.BlockSpec((1, d_in), lambda i, j: (0, 0)),             # gamma
                pl.BlockSpec((1, d_in), lambda i, j: (0, 0)),             # beta
                pl.BlockSpec((None, d_in, tn), lambda i, j: (j, 0, 0)),   # W1 block
                pl.BlockSpec((1, tn), lambda i, j: (0, j)),               # b1 tile
                pl.BlockSpec((tn, d_out), lambda i, j: (j, 0)),           # W2 rows
                pl.BlockSpec((1, d_out), lambda i, j: (0, 0)),            # b2
            ],
            out_specs=pl.BlockSpec((tile_m, d_out), lambda i, j: (i, 0)),
            scratch_shapes=scratch,
        ),
        compiler_params=pltpu.CompilerParams(
            dimension_semantics=("parallel", "arbitrary"),
            vmem_limit_bytes=vmem_limit,
        ),
    )(x2d, prep["ln_gamma"], prep["ln_beta"],
      prep["w1"], prep["b1"], prep["w2"], prep["b2"])
    return out[:n]


# ----------------------------------------------------------------------------
# MultimodalProjector forward ("mlp_downsample")
# ----------------------------------------------------------------------------
def multimodal_projector_mlp_downsample(x: jax.Array, prep: dict) -> jax.Array:
    """x: (B, S, C) -> (B, S/4, out_dim)."""
    v = downsample_block(x)                 # (B, S/4, 4C) — data movement only
    b, s4, d4 = v.shape
    out = fused_ln_mlp(v.reshape(b * s4, d4), prep)
    return out.reshape(b, s4, -1)


def init_params(in_dim: int, out_dim: int, key):
    d4 = in_dim * 4
    k1, k2, k3, k4 = jax.random.split(key, 4)
    return {
        "ln_gamma": jnp.ones((d4,), jnp.float32),
        "ln_beta": jnp.zeros((d4,), jnp.float32),
        # torch nn.Linear stores W as (out, in); we keep the transposed (in, out)
        # layout so the kernel computes x @ W1 + b1 directly.
        "w1": jax.random.normal(k1, (d4, out_dim), jnp.float32) * 0.02,
        "b1": jax.random.normal(k2, (out_dim,), jnp.float32) * 0.01,
        "w2": jax.random.normal(k3, (out_dim, out_dim), jnp.float32) * 0.02,
        "b2": jax.random.normal(k4, (out_dim,), jnp.float32) * 0.01,
    }


def _reference(x, params):
    """Plain-JAX f32 reference (DownSample -> LN -> Linear -> GELU -> Linear)."""
    v = downsample_block(x.astype(jnp.float32))
    mean = jnp.mean(v, axis=-1, keepdims=True)
    var = jnp.mean((v - mean) ** 2, axis=-1, keepdims=True)
    xn = (v - mean) / jnp.sqrt(var + 1e-5)
    xn = xn * params["ln_gamma"] + params["ln_beta"]
    h = xn @ params["w1"] + params["b1"]
    h = 0.5 * h * (1.0 + jax.lax.erf(h * _INV_SQRT2))
    return h @ params["w2"] + params["b2"]


if __name__ == "__main__":
    key = jax.random.PRNGKey(0)
    kx, kp = jax.random.split(key)

    # Small shapes consistent with the module's forward:
    #   batch=2, seq_len=16 (h=w=4), in_dim=32 -> 4*in_dim = 128, out_dim=64
    B, S, C, OUT = 2, 16, 32, 64
    x = jax.random.normal(kx, (B, S, C), jnp.float32)
    raw = init_params(C, OUT, kp)
    y_ref = _reference(x, raw)

    # Path A: weight-resident mode (default for these tiny weights).
    prep_a = prepare_projector(raw)
    y_a = multimodal_projector_mlp_downsample(x, prep_a)
    jax.block_until_ready(y_a)
    assert y_a.shape == (B, S // 4, OUT), y_a.shape
    assert jnp.allclose(y_a, y_ref, atol=2e-2, rtol=2e-1), float(
        jnp.max(jnp.abs(y_a - y_ref)))

    # Path B: hidden-tiled mode (forced, exercises the large-weight path; f32 out
    # accumulates directly into the resident output block).
    prep_b = prepare_projector(raw, force_mode="tiled")
    y_b = multimodal_projector_mlp_downsample(x, prep_b)
    jax.block_until_ready(y_b)
    assert jnp.allclose(y_b, y_ref, atol=2e-2, rtol=2e-1), float(
        jnp.max(jnp.abs(y_b - y_ref)))

    # Path B with bf16 activations/output (exercises the f32-accumulator variant
    # and the reduced-HBM-traffic activation path).
    y_c = multimodal_projector_mlp_downsample(x.astype(jnp.bfloat16), prep_b)
    jax.block_until_ready(y_c)
    assert jnp.allclose(y_c.astype(jnp.float32), y_ref, atol=1e-1, rtol=2.5e-1), \
        float(jnp.max(jnp.abs(y_c.astype(jnp.float32) - y_ref)))

    print("KERNEL_OK")
</pallas_src>

<mosaic_0001>
module attributes {stable_mosaic.version = 11 : i64} {
  func.func @_resident_kernel(%arg0: i32, %arg1: memref<8x128xf32, #tpu.memory_space<vmem>>, %arg2: memref<1x128xf32, #tpu.memory_space<vmem>>, %arg3: memref<1x128xf32, #tpu.memory_space<vmem>>, %arg4: memref<128x64xbf16, #tpu.memory_space<vmem>>, %arg5: memref<1x64xf32, #tpu.memory_space<vmem>>, %arg6: memref<64x64xbf16, #tpu.memory_space<vmem>>, %arg7: memref<1x64xf32, #tpu.memory_space<vmem>>, %arg8: memref<8x64xf32, #tpu.memory_space<vmem>>) attributes {dimension_semantics = [#tpu.dimension_semantics<parallel>], iteration_bounds = array<i64: 1>, scalar_prefetch = 0 : i64, scratch_operands = 0 : i64, tpu.core_type = #tpu.core_type<tc>, window_params = [{transform_indices = @transform_0, window_bounds = array<i64: 8, 128>}, {pipeline_mode = #tpu.pipeline_mode<synchronous>, transform_indices = @transform_1, window_bounds = array<i64: 1, 128>}, {pipeline_mode = #tpu.pipeline_mode<synchronous>, transform_indices = @transform_2, window_bounds = array<i64: 1, 128>}, {pipeline_mode = #tpu.pipeline_mode<synchronous>, transform_indices = @transform_3, window_bounds = array<i64: 128, 64>}, {pipeline_mode = #tpu.pipeline_mode<synchronous>, transform_indices = @transform_4, window_bounds = array<i64: 1, 64>}, {pipeline_mode = #tpu.pipeline_mode<synchronous>, transform_indices = @transform_5, window_bounds = array<i64: 64, 64>}, {pipeline_mode = #tpu.pipeline_mode<synchronous>, transform_indices = @transform_6, window_bounds = array<i64: 1, 64>}, {transform_indices = @transform_7, window_bounds = array<i64: 8, 64>}]} {
    %c0 = arith.constant 0 : index
    %c0_0 = arith.constant 0 : index
    %0 = vector.load %arg1[%c0, %c0_0] : memref<8x128xf32, #tpu.memory_space<vmem>>, vector<8x128xf32>
    %cst = arith.constant dense<0.000000e+00> : vector<8xf32>
    %1 = vector.multi_reduction <add>, %0, %cst [1] : vector<8x128xf32> to vector<8xf32>
    %2 = vector.shape_cast %1 : vector<8xf32> to vector<8x1xf32>
    %cst_1 = arith.constant 1.280000e+02 : f32
    %3 = vector.broadcast %cst_1 : f32 to vector<8x1xf32>
    %4 = arith.divf %2, %3 : vector<8x1xf32>
    %5 = vector.broadcast %4 : vector<8x1xf32> to vector<8x128xf32>
    %6 = arith.subf %0, %5 : vector<8x128xf32>
    %7 = arith.mulf %6, %6 : vector<8x128xf32>
    %cst_2 = arith.constant dense<0.000000e+00> : vector<8xf32>
    %8 = vector.multi_reduction <add>, %7, %cst_2 [1] : vector<8x128xf32> to vector<8xf32>
    %9 = vector.shape_cast %8 : vector<8xf32> to vector<8x1xf32>
    %cst_3 = arith.constant 1.280000e+02 : f32
    %10 = vector.broadcast %cst_3 : f32 to vector<8x1xf32>
    %11 = arith.divf %9, %10 : vector<8x1xf32>
    %cst_4 = arith.constant 9.99999974E-6 : f32
    %12 = vector.broadcast %cst_4 : f32 to vector<8x1xf32>
    %13 = arith.addf %11, %12 : vector<8x1xf32>
    %14 = math.rsqrt %13 : vector<8x1xf32>
    %15 = vector.broadcast %14 : vector<8x1xf32> to vector<8x128xf32>
    %16 = arith.mulf %6, %15 : vector<8x128xf32>
    %c0_5 = arith.constant 0 : index
    %c0_6 = arith.constant 0 : index
    %17 = vector.load %arg2[%c0_5, %c0_6] : memref<1x128xf32, #tpu.memory_space<vmem>>, vector<1x128xf32>
    %18 = vector.broadcast %17 : vector<1x128xf32> to vector<8x128xf32>
    %19 = arith.mulf %16, %18 : vector<8x128xf32>
    %c0_7 = arith.constant 0 : index
    %c0_8 = arith.constant 0 : index
    %20 = vector.load %arg3[%c0_7, %c0_8] : memref<1x128xf32, #tpu.memory_space<vmem>>, vector<1x128xf32>
    %21 = vector.broadcast %20 : vector<1x128xf32> to vector<8x128xf32>
    %22 = arith.addf %19, %21 : vector<8x128xf32>
    %23 = arith.truncf %22 : vector<8x128xf32> to vector<8x128xbf16>
    %c0_9 = arith.constant 0 : index
    %c0_10 = arith.constant 0 : index
    %24 = vector.load %arg4[%c0_9, %c0_10] : memref<128x64xbf16, #tpu.memory_space<vmem>>, vector<128x64xbf16>
    %cst_11 = arith.constant dense<0.000000e+00> : vector<8x64xf32>
    %25 = tpu.matmul %23, %24, %cst_11 {dimension_numbers = #tpu.dot_dimension_numbers<[1], [0], [0], [1], [0, 0, 1, 1], [], []>} : vector<8x128xbf16>, vector<128x64xbf16>, vector<8x64xf32> -> vector<8x64xf32>
    %c0_12 = arith.constant 0 : index
    %c0_13 = arith.constant 0 : index
    %26 = vector.load %arg5[%c0_12, %c0_13] : memref<1x64xf32, #tpu.memory_space<vmem>>, vector<1x64xf32>
    %27 = vector.broadcast %26 : vector<1x64xf32> to vector<8x64xf32>
    %28 = arith.addf %25, %27 : vector<8x64xf32>
    %cst_14 = arith.constant 5.000000e-01 : f32
    %29 = vector.broadcast %cst_14 : f32 to vector<8x64xf32>
    %30 = arith.mulf %29, %28 : vector<8x64xf32>
    %cst_15 = arith.constant 0.707106769 : f32
    %31 = vector.broadcast %cst_15 : f32 to vector<8x64xf32>
    %32 = arith.mulf %28, %31 : vector<8x64xf32>
    %33 = math.erf %32 : vector<8x64xf32>
    %cst_16 = arith.constant 1.000000e+00 : f32
    %34 = vector.broadcast %cst_16 : f32 to vector<8x64xf32>
    %35 = arith.addf %34, %33 : vector<8x64xf32>
    %36 = arith.mulf %30, %35 : vector<8x64xf32>
    %37 = arith.truncf %36 : vector<8x64xf32> to vector<8x64xbf16>
    %c0_17 = arith.constant 0 : index
    %c0_18 = arith.constant 0 : index
    %38 = vector.load %arg6[%c0_17, %c0_18] : memref<64x64xbf16, #tpu.memory_space<vmem>>, vector<64x64xbf16>
    %cst_19 = arith.constant dense<0.000000e+00> : vector<8x64xf32>
    %39 = tpu.matmul %37, %38, %cst_19 {dimension_numbers = #tpu.dot_dimension_numbers<[1], [0], [0], [1], [0, 0, 1, 1], [], []>} : vector<8x64xbf16>, vector<64x64xbf16>, vector<8x64xf32> -> vector<8x64xf32>
    %c0_20 = arith.constant 0 : index
    %c0_21 = arith.constant 0 : index
    %40 = vector.load %arg7[%c0_20, %c0_21] : memref<1x64xf32, #tpu.memory_space<vmem>>, vector<1x64xf32>
    %41 = vector.broadcast %40 : vector<1x64xf32> to vector<8x64xf32>
    %42 = arith.addf %39, %41 : vector<8x64xf32>
    %c0_22 = arith.constant 0 : index
    %c0_23 = arith.constant 0 : index
    %43 = vector.load %arg8[%c0_22, %c0_23] : memref<8x64xf32, #tpu.memory_space<vmem>>, vector<8x64xf32>
    tpu.vector_store %arg8[%c0_22, %c0_23], %42 {strides = array<i32>} : memref<8x64xf32, #tpu.memory_space<vmem>>, vector<8x64xf32>,
    return
  }
  func.func @transform_0(%arg0: i32) -> (i32, i32) {
    %c0_i32 = arith.constant 0 : i32
    %c0_i32_0 = arith.constant 0 : i32
    return %arg0, %c0_i32 : i32, i32
  }
  func.func @transform_1(%arg0: i32) -> (i32, i32) {
    %c0_i32 = arith.constant 0 : i32
    %c0_i32_0 = arith.constant 0 : i32
    %c0_i32_1 = arith.constant 0 : i32
    return %c0_i32, %c0_i32_0 : i32, i32
  }
  func.func @transform_2(%arg0: i32) -> (i32, i32) {
    %c0_i32 = arith.constant 0 : i32
    %c0_i32_0 = arith.constant 0 : i32
    %c0_i32_1 = arith.constant 0 : i32
    return %c0_i32, %c0_i32_0 : i32, i32
  }
  func.func @transform_3(%arg0: i32) -> (i32, i32) {
    %c0_i32 = arith.constant 0 : i32
    %c0_i32_0 = arith.constant 0 : i32
    %c0_i32_1 = arith.constant 0 : i32
    return %c0_i32, %c0_i32_0 : i32, i32
  }
  func.func @transform_4(%arg0: i32) -> (i32, i32) {
    %c0_i32 = arith.constant 0 : i32
    %c0_i32_0 = arith.constant 0 : i32
    %c0_i32_1 = arith.constant 0 : i32
    return %c0_i32, %c0_i32_0 : i32, i32
  }
  func.func @transform_5(%arg0: i32) -> (i32, i32) {
    %c0_i32 = arith.constant 0 : i32
    %c0_i32_0 = arith.constant 0 : i32
    %c0_i32_1 = arith.constant 0 : i32
    return %c0_i32, %c0_i32_0 : i32, i32
  }
  func.func @transform_6(%arg0: i32) -> (i32, i32) {
    %c0_i32 = arith.constant 0 : i32
    %c0_i32_0 = arith.constant 0 : i32
    %c0_i32_1 = arith.constant 0 : i32
    return %c0_i32, %c0_i32_0 : i32, i32
  }
  func.func @transform_7(%arg0: i32) -> (i32, i32) {
    %c0_i32 = arith.constant 0 : i32
    %c0_i32_0 = arith.constant 0 : i32
    return %arg0, %c0_i32 : i32, i32
  }
}

</mosaic_0001>

<bundles_post_ra>
// kernel: tpu_custom_call.1
= control target key start
LH: loop header
LB: loop body
LE: loop exit
PB: predicated region body
PF: predicated region fallthrough
CT: control target
= control target key end

     0   :  { %s459_s0 = inlined_call_operand.vmem [shape: f32[8,128], index: 0, kind: input, shape index: {}]   ;;  %s460_s1 = inlined_call_operand.vmem [shape: f32[1,128], index: 1, kind: input, shape index: {}]   ;;  %s461_s2 = inlined_call_operand.vmem [shape: f32[1,128], index: 2, kind: input, shape index: {}]   ;;  %s462_s3 = inlined_call_operand.vmem [shape: bf16[128,64], index: 3, kind: input, shape index: {}]   ;;  %s463_s4 = inlined_call_operand.vmem [shape: f32[1,64], index: 4, kind: input, shape index: {}]   ;;  %s464_s5 = inlined_call_operand.vmem [shape: bf16[64,64], index: 5, kind: input, shape index: {}]   ;;  %s465_s6 = inlined_call_operand.vmem [shape: f32[1,64], index: 6, kind: input, shape index: {}]   ;;  %s466_s7 = inlined_call_operand.hbm [shape: f32[8,64], index: 7, kind: output, shape index: {}]  }
   0x1   :  { %v28_v0 = vld [vmem:[%s459_s0] sm:$0xff] }
   0x2   :  { %29 = vadd.xlane.f32.xlu0 %v28_v0 }
   0x3   :  { %12 = vsyncpa [#allocation3], 0  ;;  %v363_v1 = vmov 128.0   ;;  %v320_v2 = vld [vmem:[%s462_s3 + $0x38] sm:$0xff]  ;;  %v319_v13 = vld [vmem:[%s462_s3 + $0x30] sm:$0xff]  ;;  %vm229_vm8 = vcmask 523264  }
   0x4   :  { %331 = vrcp.f32 %v363_v1  ;;  %135 = vmatpush.bf16.msra.mxu0 %v320_v2  ;;  %v318_v14 = vld [vmem:[%s462_s3 + $0x28] sm:$0xff]  ;;  %v317_v15 = vld [vmem:[%s462_s3 + $0x20] sm:$0xff]  ;;  %v316_v16 = vld [vmem:[%s462_s3 + $0x18] sm:$0xff]  ;;  %s364_s28 = smov [#allocation2]   ;;  %s254_s9 = sshll.u32 %s466_s7, 4  ;;  %s255_s9 = int_to_ptr.hbm [resolvable:$true] %s254_s9 }
   0x5   :  { %v315_v17 = vld [vmem:[%s462_s3 + $0x10] sm:$0xff]  ;;  %v314_v18 = vld [vmem:[%s462_s3 + $0x8] sm:$0xff]  ;;  %v313_v19 = vld [vmem:[%s462_s3] sm:$0xff]  ;;  %s252_s29 = sshll.u32 %s364_s28, 4  ;;  %s253_s29 = int_to_ptr.vmem [resolvable:$true] %s252_s29 }
   0x6   :  { %v327_v29 = vld [vmem:[%s460_s1] ss:$0 sm:$0xff]  ;;  %v324_v43 = vld [vmem:[%s464_s5 + $0x18] sm:$0xff]  ;;  %v323_v48 = vld [vmem:[%s464_s5 + $0x10] sm:$0xff] }
   0x7   :  { %v328_v32 = vld [vmem:[%s461_s2] ss:$0 sm:$0xff]  ;;  %237 = vmatpush.bf16.msra.mxu1 %v324_v43  ;;  %v322_v51 = vld [vmem:[%s464_s5 + $0x8] sm:$0xff] }
   0x8   :  { %136 = vmatpush.bf16.msra.mxu0 %v319_v13  ;;  %v329_v36 = vld [vmem:[%s463_s4] ss:$0 sm:$0xff] }
   0x9   :  { %v321_v55 = vld [vmem:[%s464_s5] sm:$0xff] }
   0xa   :  { %v332_v3 = vpop.eup %331 }
   0xb   :  { %v32_v4 = vmul.f32 128.0, %v332_v3  ;;  %vm36_vm0 = vweird.f32 %v332_v3  ;;  %238 = vmatpush.bf16.msra.mxu1 %v323_v48 }
   0xc   :  { %137 = vmatpush.bf16.msra.mxu0 %v318_v14 }
   0xd   :  { %v33_v5 = vsub.f32 1.0, %v32_v4 }
   0xf   :  { %v34_v6 = vmul.f32 %v332_v3, %v33_v5  ;;  %239 = vmatpush.bf16.msra.mxu1 %v322_v51 }
  0x10   :  { %138 = vmatpush.bf16.msra.mxu0 %v317_v15 }
  0x11   :  { %v35_v7 = vadd.f32 %v332_v3, %v34_v6 }
  0x13   :  { %v37_v8 = vsel %vm36_vm0, %v332_v3, %v35_v7  ;;  %240 = vmatpush.bf16.msra.mxu1 %v321_v55 }
  0x14   :  { %139 = vmatpush.bf16.msra.mxu0 %v316_v16 }
  0x18   :  { %140 = vmatpush.bf16.msra.mxu0 %v315_v17 }
  0x1c   :  { %141 = vmatpush.bf16.msra.mxu0 %v314_v18 }
  0x20   :  { %142 = vmatpush.bf16.msra.mxu0 %v313_v19 }
  0x75   :  { %v30_v9 = vpop.xlane.xlu0 %29 }
  0x76   :  { %v38_v10 = vmul.f32 %v37_v8, %v30_v9 }
  0x78   :  { %v39_v11 = vsub.f32 %v28_v0, %v38_v10 }
  0x7a   :  { %v40_v12 = vmul.f32 %v39_v11, %v39_v11 }
  0x7c   :  { %41 = vadd.xlane.f32.xlu0 %v40_v12 }
  0xef   :  { %v42_v20 = vpop.xlane.xlu0 %41 }
  0xf0   :  { %v43_v21 = vmul.f32 %v42_v20, %v37_v8  ;;  %v330_v20 = vld [vmem:[%s465_s6] ss:$0 sm:$0xff] }
  0xf2   :  { %v44_v22 = vadd.f32 1e-05, %v43_v21 }
  0xf4   :  { %333 = vrsqrt.f32 %v44_v22  ;;  %vm51_vm2 = vweird.f32 %v44_v22 }
  0xfa   :  { %v334_v23 = vpop.eup %333 }
  0xfb   :  { %v46_v24 = vmul.f32 %v334_v23, %v44_v22  ;;  %vm52_vm1 = vweird.f32 %v334_v23 }
  0xfc   :  { %vm53_vm3 = vmor %vm51_vm2, %vm52_vm1 }
  0xfd   :  { %v47_v25 = vmul.f32 %v334_v23, %v46_v24 }
  0xff   :  { %v48_v26 = vmul.f32 0.5, %v47_v25 }
 0x101   :  { %v49_v27 = vsub.f32 1.5, %v48_v26 }
 0x103   :  { %v50_v28 = vmul.f32 %v334_v23, %v49_v27 }
 0x105   :  { %v54_v30 = vsel %vm53_vm3, %v334_v23, %v50_v28 }
 0x106   :  { %v55_v31 = vmul.f32 %v54_v30, %v39_v11 }
 0x108   :  { %v60_v33 = vmul.f32 %v327_v29, %v55_v31 }
 0x10a   :  { %v65_v34 = vadd.f32 %v328_v32, %v60_v33 }
 0x10c   :  { %v66_v35 = vpack.c.bf16 %v65_v34, %v65_v34 }
 0x10e   :  { %143 = vmatmul.bf16.vlgmr.msra.gmra.mxu0 %v66_v35 }
 0x18b   :  { %v144_v37 = vpop.f32.mrf.mxu0 }
 0x18c   :  { %v145_v38 = vadd.f32 %v329_v36, %v144_v37 }
 0x18e   :  { %v149_v39 = vmul.f32 0.70710677, %v145_v38  ;;  %v148_v16 = vmul.f32 0.5, %v145_v38 }
 0x190   :  { %v150_v40 = vmul.f32 %v149_v39, %v149_v39 }
 0x192   :  { %v151_v41 = vmin.f32 %v150_v40, 16.0 }
 0x193   :  { %v146_v42 = vpop.f32.mrf.mxu0 }
 0x194   :  { %v152_v44 = vmul.f32 2.1237322e-06, %v151_v41  ;;  %v163_v45 = vmul.f32 3.8918573e-05, %v151_v41 }
 0x196   :  { %v153_v46 = vadd.f32 0.00028619796, %v152_v44  ;;  %v164_v47 = vadd.f32 0.001143296, %v163_v45 }
 0x198   :  { %v154_v49 = vmul.f32 %v153_v46, %v151_v41  ;;  %v165_v50 = vmul.f32 %v164_v47, %v151_v41 }
 0x19a   :  { %v166_v52 = vadd.f32 0.014752088, %v165_v50  ;;  %v155_v53 = vadd.f32 0.0036580483, %v154_v49 }
 0x19c   :  { %v167_v54 = vmul.f32 %v166_v52, %v151_v41  ;;  %v156_v57 = vmul.f32 %v155_v53, %v151_v41 }
 0x19e   :  { %v168_v56 = vadd.f32 0.112945676, %v167_v54  ;;  %v157_v60 = vadd.f32 0.05243302, %v156_v57 }
 0x1a0   :  { %v169_v58 = vmul.f32 %v168_v56, %v151_v41  ;;  %v158_v63 = vmul.f32 %v157_v60, %v151_v41 }
 0x1a2   :  { %v170_v59 = vadd.f32 0.4994258, %v169_v58  ;;  %v159_v0 = vadd.f32 0.18741608, %v158_v63 }
 0x1a4   :  { %v171_v61 = vmul.f32 %v170_v59, %v151_v41  ;;  %v160_v2 = vmul.f32 %v159_v0, %v151_v41 }
 0x1a6   :  { %v172_v62 = vadd.f32 1.0, %v171_v61  ;;  %v161_v6 = vadd.f32 1.1283791, %v160_v2 }
 0x1a8   :  { %335 = vrcp.f32 %v172_v62  ;;  %v184_v5 = vand.u32 2147483648, %v172_v62  ;;  %v182_v8 = vand.u32 2147483647, %v172_v62  ;;  %vm178_vm5 = vweird.f32 %v172_v62 }
 0x1a9   :  { %v162_v11 = vmul.f32 %v161_v6, %v149_v39 }
 0x1aa   :  { %v185_v10 = vor.u32 1.1754944e-38, %v184_v5  ;;  %vm183_vm7 = vcmp.eq.f32.partialorder %v182_v8, 8.507059e+37 }
 0x1ae   :  { %v336_v1 = vpop.eup %335 }
 0x1af   :  { %v174_v3 = vmul.f32 %v336_v1, %v172_v62  ;;  %vm179_vm4 = vweird.f32 %v336_v1 }
 0x1b0   :  { %vm180_vm6 = vmor %vm178_vm5, %vm179_vm4 }
 0x1b1   :  { %v175_v4 = vsub.f32 1.0, %v174_v3 }
 0x1b3   :  { %v176_v7 = vmul.f32 %v336_v1, %v175_v4 }
 0x1b5   :  { %v177_v9 = vadd.f32 %v336_v1, %v176_v7 }
 0x1b7   :  { %v181_v12 = vsel %vm180_vm6, %v336_v1, %v177_v9 }
 0x1b8   :  { %v186_v13 = vsel %vm183_vm7, %v185_v10, %v181_v12 }
 0x1b9   :  { %v187_v14 = vmul.f32 %v186_v13, %v162_v11 }
 0x1bb   :  { %v295_v15 = vclamps-f32 %v187_v14, 1.0 }
 0x1bd   :  { %v190_v17 = vadd.f32 1.0, %v295_v15 }
 0x1bf   :  { %v191_v18 = vmul.f32 %v190_v17, %v148_v16 }
 0x1c1   :  { %v192_v19 = vpack.c.bf16 %v191_v18, %v191_v18 }
 0x1c3   :  { %312 = vmatmul.msk.bf16.vlgmr.msra.gmra.mxu1 %vm229_vm8, %v192_v19 }
 0x240   :  { %v242_v21 = vpop.f32.mrf.mxu1 }
 0x241   :  { %v243_v22 = vadd.f32 %v330_v20, %v242_v21 }
 0x243   :  { %246 = vst.msk [vmem:[#allocation2] sm:$0xff] %vm229_vm8, %v243_v22 }
 0x244   :  { %257 = dma.vmem_to_hbm [thread:$0]  %s253_s29, 128, %s255_s9, [#allocation3]  }
 0x248   :  { %v244_v23 = vpop.f32.mrf.mxu1 }
 0x249   :  { %361 = dma.done.wait [#allocation3], 128  }
 0x24a   :  { %362 = vsyncadd [#allocation3], 4294967168 }
 0x24b   :  { %262 = vsyncpa [#allocation3], 1 }

</bundles_post_ra>
